<compile_context>
chip_gen: v7x
topology: tpu7x:2x2x1
jax: 0.10.0
libtpu: 0.0.40
codegen_flags: <defaults>
</compile_context>

<pallas_src>
import functools

import jax
import jax.numpy as jnp
from jax.experimental import pallas as pl
from jax.experimental.pallas import tpu as pltpu


def _t5_layernorm_kernel(x_ref, w_ref, o_ref, *, eps: float, downcast_before_scale: bool):
    # fp32 accumulation regardless of input dtype (matches the PyTorch module).
    x_f32 = x_ref[...].astype(jnp.float32)
    variance = jnp.mean(x_f32 * x_f32, axis=-1, keepdims=True)      # (tile_rows, 1)
    y = x_f32 * jax.lax.rsqrt(variance + eps)                       # fp32
    w = w_ref[...]                                                  # (1, d_model)
    if downcast_before_scale:
        # torch: hidden_states.to(weight.dtype) BEFORE scaling when weight is half.
        y = y.astype(w.dtype)
    o_ref[...] = (w * y).astype(o_ref.dtype)


def _round_up(x: int, m: int) -> int:
    return (x + m - 1) // m * m


def _t5_layer_norm_xla(hidden_states, weight, eps):
    # Pure-JAX path mirroring the torch forward (used as reference and as the
    # fallback for lane-sparse d_model).
    x_f32 = hidden_states.astype(jnp.float32)
    var = jnp.mean(x_f32 * x_f32, axis=-1, keepdims=True)
    h = x_f32 * jax.lax.rsqrt(var + eps)
    if weight.dtype in (jnp.float16, jnp.bfloat16):
        h = h.astype(weight.dtype)
    return weight * h


def t5_layer_norm(hidden_states: jax.Array, weight: jax.Array, eps: float = 1e-6) -> jax.Array:
    """RMS LayerNorm over the last dim of `hidden_states`, scaled by `weight`."""
    d_model = hidden_states.shape[-1]
    assert weight.shape == (d_model,)

    # Lane-sparse d_model wastes >= 75% of VPU width and store bandwidth in the
    # kernel; plain XLA is at least as good there.
    if d_model % 128 != 0:
        return _t5_layer_norm_xla(hidden_states, weight, eps)

    orig_shape = hidden_states.shape
    x2d = hidden_states.reshape(-1, d_model)
    rows = x2d.shape[0]

    in_item = jnp.dtype(x2d.dtype).itemsize

    # Output dtype follows torch promotion: if weight is half precision, the
    # normalized hidden is downcast to weight dtype before the scale; otherwise
    # the product stays in fp32.
    weight_is_half = weight.dtype in (jnp.float16, jnp.bfloat16)
    out_dtype = weight.dtype if weight_is_half else jnp.promote_types(weight.dtype, jnp.float32)
    out_item = jnp.dtype(out_dtype).itemsize

    # Sublane packing from BOTH input and output dtypes (8 rows per 32-bit,
    # 16 for 16-bit, 32 for 8-bit) so loads AND stores stay sublane-dense.
    min_item = max(1, min(in_item, out_item))
    sublane = 8 * max(1, 4 // min_item)

    # ---- Generation-gated budgets (v5e/v6e: 128 MiB VMEM; v7x: 64 MiB / TC) ----
    try:
        vmem_cap = int(getattr(pltpu.get_tpu_info(), "vmem_capacity_bytes", 0)) or (64 << 20)
    except Exception:  # pragma: no cover - defensive; assume smallest (v7x-like)
        vmem_cap = 64 << 20
    if vmem_cap >= (96 << 20):        # v5e / v6e class
        target_step_bytes = 16 << 20  # per-step HBM traffic (input + output)
        vmem_use_budget = 80 << 20    # working-set budget used for tile sizing
        hard_cap = 100 << 20          # vmem_limit_bytes ceiling
    else:                             # v7x class (64 MiB per TensorCore)
        target_step_bytes = 12 << 20
        vmem_use_budget = 44 << 20
        hard_cap = 48 << 20

    # ---- Tile selection ----
    # Per-row VMEM footprint: double-buffered in+out blocks + fp32 temps
    # (x_f32 and the normalized y materialize at 4 bytes/elem for 16-bit inputs).
    hbm_row_bytes = d_model * (in_item + out_item)
    vmem_row_bytes = 2 * d_model * (in_item + out_item) + 2 * d_model * 4

    total_su = pl.cdiv(rows, sublane)                     # rows in sublane units
    budget_su_traffic = max(1, target_step_bytes // (hbm_row_bytes * sublane))
    budget_su_vmem = max(1, vmem_use_budget // (vmem_row_bytes * sublane))
    tile_su = max(1, min(budget_su_traffic, budget_su_vmem, total_su))

    # Keep >= 4 grid steps when rows allow (>= 2 per TensorCore on dual-TC parts)
    # so prefetch-next / writeback-prev overlap on both cores.
    MIN_STEPS = 4
    if total_su >= MIN_STEPS and pl.cdiv(total_su, tile_su) < MIN_STEPS:
        tile_su = max(1, pl.cdiv(total_su, MIN_STEPS))
    tile_rows = tile_su * sublane

    # Ragged last block: no jnp.pad / slicing — Pallas masks OOB writes and the
    # garbage OOB reads only affect rows that are never stored.
    grid = (pl.cdiv(rows, tile_rows),)

    w2d = weight.reshape(1, d_model)

    # Honest VMEM accounting: double-buffered in/out blocks + fp32 intermediates
    # + (padded) resident weight row, plus a little compiler headroom.
    in_block = tile_rows * d_model * in_item
    out_block = tile_rows * d_model * out_item
    f32_temps = 2 * tile_rows * d_model * 4
    w_block = 8 * _round_up(d_model, 128) * 4
    needed = 2 * (in_block + out_block) + f32_temps + w_block
    vmem_limit = int(min(max(needed + (4 << 20), 16 << 20), hard_cap))

    kernel = functools.partial(
        _t5_layernorm_kernel, eps=eps, downcast_before_scale=weight_is_half)

    out = pl.pallas_call(
        kernel,
        out_shape=jax.ShapeDtypeStruct((rows, d_model), out_dtype),
        grid=grid,
        in_specs=[
            pl.BlockSpec((tile_rows, d_model), lambda i: (i, 0)),
            # Constant block index -> the weight is DMA'd once and stays resident
            # in VMEM for the whole grid (no per-step re-fetch).
            pl.BlockSpec((1, d_model), lambda i: (0, 0)),
        ],
        out_specs=pl.BlockSpec((tile_rows, d_model), lambda i: (i, 0)),
        compiler_params=pltpu.CompilerParams(
            # "parallel" lets the row axis shard across TensorCores on dual-TC
            # parts. TODO(synk): verify megacore sharding on v7x and consider
            # pltpu.CORE_PARALLEL if it does not split automatically.
            dimension_semantics=("parallel",),
            vmem_limit_bytes=vmem_limit,
        ),
    )(x2d, w2d)

    return out.reshape(orig_shape)


if __name__ == "__main__":
    key = jax.random.PRNGKey(0)
    eps = 1e-6
    batch, seq, d_model = 2, 8, 128
    k1, k2 = jax.random.split(key)

    # ---- fp32 input, fp32 weight (module init: torch.ones(d_model)) ----
    hidden_states = jax.random.normal(k1, (batch, seq, d_model), dtype=jnp.float32)
    weight = jnp.ones((d_model,), dtype=jnp.float32)
    out = jax.block_until_ready(t5_layer_norm(hidden_states, weight, eps=eps))
    ref = _t5_layer_norm_xla(hidden_states, weight, eps)
    assert out.shape == hidden_states.shape and out.dtype == ref.dtype
    assert jnp.allclose(out, ref, atol=1e-5, rtol=1e-5)

    # ---- non-trivial weight, ragged row count (15 rows, exercises masked last block) ----
    hs_ragged = jax.random.normal(k2, (3, 5, d_model), dtype=jnp.float32)
    w_rand = 1.0 + 0.1 * jax.random.normal(k2, (d_model,), dtype=jnp.float32)
    out_r = jax.block_until_ready(t5_layer_norm(hs_ragged, w_rand, eps=eps))
    ref_r = _t5_layer_norm_xla(hs_ragged, w_rand, eps)
    assert out_r.shape == hs_ragged.shape
    assert jnp.allclose(out_r, ref_r, atol=1e-5, rtol=1e-5)

    # ---- bf16 input + bf16 weight (exercises torch's downcast-before-scale path) ----
    hs_bf16 = hidden_states.astype(jnp.bfloat16)
    w_bf16 = weight.astype(jnp.bfloat16)
    out_bf16 = jax.block_until_ready(t5_layer_norm(hs_bf16, w_bf16, eps=eps))
    ref_bf16 = _t5_layer_norm_xla(hs_bf16, w_bf16, eps)
    assert out_bf16.dtype == jnp.bfloat16
    assert jnp.allclose(out_bf16.astype(jnp.float32), ref_bf16.astype(jnp.float32),
                        atol=2e-2, rtol=2e-2)

    # ---- tiny d_model (lane-sparse) goes through the XLA fallback path ----
    hs_small = jax.random.normal(k1, (2, 8, 32), dtype=jnp.float32)
    w_small = jnp.ones((32,), dtype=jnp.float32)
    out_small = jax.block_until_ready(t5_layer_norm(hs_small, w_small, eps=eps))
    assert jnp.allclose(out_small, _t5_layer_norm_xla(hs_small, w_small, eps),
                        atol=1e-5, rtol=1e-5)

    print("KERNEL_OK")
</pallas_src>

<mosaic_0001>
module attributes {stable_mosaic.version = 11 : i64} {
  func.func @_t5_layernorm_kernel(%arg0: i32, %arg1: memref<16x128xf32, #tpu.memory_space<vmem>>, %arg2: memref<1x128xf32, #tpu.memory_space<vmem>>, %arg3: memref<16x128xf32, #tpu.memory_space<vmem>>) attributes {dimension_semantics = [#tpu.dimension_semantics<parallel>], iteration_bounds = array<i64: 1>, scalar_prefetch = 0 : i64, scratch_operands = 0 : i64, tpu.core_type = #tpu.core_type<tc>, window_params = [{transform_indices = @transform_0, window_bounds = array<i64: 16, 128>}, {pipeline_mode = #tpu.pipeline_mode<synchronous>, transform_indices = @transform_1, window_bounds = array<i64: 1, 128>}, {transform_indices = @transform_2, window_bounds = array<i64: 16, 128>}]} {
    %c0 = arith.constant 0 : index
    %c0_0 = arith.constant 0 : index
    %0 = vector.load %arg1[%c0, %c0_0] : memref<16x128xf32, #tpu.memory_space<vmem>>, vector<16x128xf32>
    %1 = arith.mulf %0, %0 : vector<16x128xf32>
    %cst = arith.constant dense<0.000000e+00> : vector<16xf32>
    %2 = vector.multi_reduction <add>, %1, %cst [1] : vector<16x128xf32> to vector<16xf32>
    %3 = vector.shape_cast %2 : vector<16xf32> to vector<16x1xf32>
    %cst_1 = arith.constant 1.280000e+02 : f32
    %4 = vector.broadcast %cst_1 : f32 to vector<16x1xf32>
    %5 = arith.divf %3, %4 : vector<16x1xf32>
    %cst_2 = arith.constant 9.99999997E-7 : f32
    %6 = vector.broadcast %cst_2 : f32 to vector<16x1xf32>
    %7 = arith.addf %5, %6 : vector<16x1xf32>
    %8 = math.rsqrt %7 : vector<16x1xf32>
    %9 = vector.broadcast %8 : vector<16x1xf32> to vector<16x128xf32>
    %10 = arith.mulf %0, %9 : vector<16x128xf32>
    %c0_3 = arith.constant 0 : index
    %c0_4 = arith.constant 0 : index
    %11 = vector.load %arg2[%c0_3, %c0_4] : memref<1x128xf32, #tpu.memory_space<vmem>>, vector<1x128xf32>
    %12 = vector.broadcast %11 : vector<1x128xf32> to vector<16x128xf32>
    %13 = arith.mulf %12, %10 : vector<16x128xf32>
    %c0_5 = arith.constant 0 : index
    %c0_6 = arith.constant 0 : index
    %14 = vector.load %arg3[%c0_5, %c0_6] : memref<16x128xf32, #tpu.memory_space<vmem>>, vector<16x128xf32>
    tpu.vector_store %arg3[%c0_5, %c0_6], %13 {strides = array<i32>} : memref<16x128xf32, #tpu.memory_space<vmem>>, vector<16x128xf32>,
    return
  }
  func.func @transform_0(%arg0: i32) -> (i32, i32) {
    %c0_i32 = arith.constant 0 : i32
    %c0_i32_0 = arith.constant 0 : i32
    return %arg0, %c0_i32 : i32, i32
  }
  func.func @transform_1(%arg0: i32) -> (i32, i32) {
    %c0_i32 = arith.constant 0 : i32
    %c0_i32_0 = arith.constant 0 : i32
    %c0_i32_1 = arith.constant 0 : i32
    return %c0_i32, %c0_i32_0 : i32, i32
  }
  func.func @transform_2(%arg0: i32) -> (i32, i32) {
    %c0_i32 = arith.constant 0 : i32
    %c0_i32_0 = arith.constant 0 : i32
    return %arg0, %c0_i32 : i32, i32
  }
}

</mosaic_0001>

<bundles_post_ra>
// kernel: tpu_custom_call.1
= control target key start
LH: loop header
LB: loop body
LE: loop exit
PB: predicated region body
PF: predicated region fallthrough
CT: control target
= control target key end

     0   :  { %7 = vsyncpa [#allocation3], 0  ;;  %s180_s0 = inlined_call_operand.hbm [shape: f32[16,128], index: 0, kind: input, shape index: {}]   ;;  %s181_s1 = inlined_call_operand.vmem [shape: f32[1,128], index: 1, kind: input, shape index: {}]   ;;  %s182_s2 = inlined_call_operand.hbm [shape: f32[16,128], index: 2, kind: output, shape index: {}]  }
   0x1   :  { %8 = vsyncpa [#allocation4], 0  ;;  %s128_s9 = smov [#allocation2]   ;;  %s80_s13 = scalar_lea.hbm %s180_s0, 256 }
   0x2   :  { %s14_s10 = sshll.u32 %s128_s9, 4  ;;  %p81_p0 = scmp.ne.s32.totalorder %s180_s0, %s80_s13  ;;  %s15_s10 = int_to_ptr.vmem [resolvable:$true] %s14_s10 }
   0x3   :  { %p84_p1 = scmp.lt.u32.totalorder %s80_s13, %s180_s0 }
   0x5   :  { %p86_p2 = pnand %p84_p1, %p81_p0 }
   0x7   :  { %89 = shalt.err (!%p86_p2)
}
   0x8   :  { %s90_s18 = scalar_lea.vmem %s15_s10, 256  ;;  %p95_p4 = scmp.lt.s32.totalorder %s15_s10, %s15_s10 }
   0x9   :  { %p91_p3 = scmp.ne.s32.totalorder %s15_s10, %s90_s18  ;;  %p96_p5 = scmp.lt.s32.totalorder %s90_s18, %s90_s18 }
   0xb   :  { %p97_p6 = por %p96_p5, %p95_p4 }
   0xd   :  { %p98_p7 = pnand %p97_p6, %p91_p3 }
   0xf   :  { %101 = shalt.err (!%p98_p7)
}
  0x10   :  { %s129_s19 = smov 128   ;;  %s130_s20 = smov 8  }
  0x11   :  { %20 = dma.hbm_to_vmem [thread:$0]  %s180_s0, 256, %s15_s10, [#allocation3], %s129_s19, %s129_s19, %s130_s20  }
  0x12   :  { %124 = dma.done.wait [#allocation3], 256  }
  0x13   :  { %125 = vsyncadd [#allocation3], 4294967040  ;;  %v26_v0 = vld [vmem:[#allocation2] sm:$0xff]  ;;  %v27_v1 = vld [vmem:[#allocation2 + $0x8] sm:$0xff]  ;;  %s131_s0 = smov [#allocation5]  }
  0x14   :  { %v28_v2 = vmul.f32 %v26_v0, %v26_v0  ;;  %v29_v3 = vmul.f32 %v27_v1, %v27_v1  ;;  %v71_v11 = vld [vmem:[%s181_s1] ss:$0 sm:$0xff]  ;;  %s59_s25 = sshll.u32 %s131_s0, 4  ;;  %s60_s25 = int_to_ptr.vmem [resolvable:$true] %s59_s25 }
  0x15   :  { %s102_s26 = scalar_lea.vmem %s60_s25, 256  ;;  %p107_p9 = scmp.lt.s32.totalorder %s60_s25, %s60_s25 }
  0x16   :  { %30 = vadd.xlane.f32.xlu0 %v28_v2  ;;  %p103_p8 = scmp.ne.s32.totalorder %s60_s25, %s102_s26  ;;  %p108_p10 = scmp.lt.s32.totalorder %s102_s26, %s102_s26 }
  0x18   :  { %p109_p11 = por %p108_p10, %p107_p9 }
  0x1a   :  { %32 = vadd.xlane.f32.xlu0 %v29_v3  ;;  %p110_p12 = pnand %p109_p11, %p103_p8 }
  0xa3   :  { %v31_v4 = vpop.xlane.xlu0 %30 }
  0xa4   :  { %v35_v5 = vmul.f32 0.0078125, %v31_v4 }
  0xa6   :  { %v37_v6 = vadd.f32 1e-06, %v35_v5 }
  0xa7   :  { %v33_v7 = vpop.xlane.xlu0 %32 }
  0xa8   :  { %76 = vrsqrt.f32 %v37_v6  ;;  %v36_v8 = vmul.f32 0.0078125, %v33_v7 }
  0xaa   :  { %v38_v9 = vadd.f32 1e-06, %v36_v8 }
  0xac   :  { %78 = vrsqrt.f32 %v38_v9 }
  0xb2   :  { %v77_v10 = vpop.eup %76 }
  0xb3   :  { %v41_v12 = vmul.f32 %v77_v10, %v26_v0 }
  0xb5   :  { %v50_v13 = vmul.f32 %v71_v11, %v41_v12 }
  0xb6   :  { %v79_v14 = vpop.eup %78 }
  0xb7   :  { %v42_v15 = vmul.f32 %v79_v14, %v27_v1  ;;  %52 = vst [vmem:[#allocation5] sm:$0xff] %v50_v13 }
  0xb9   :  { %v51_v16 = vmul.f32 %v71_v11, %v42_v15 }
  0xbb   :  { %53 = vst [vmem:[#allocation5 + $0x8] sm:$0xff] %v51_v16 }
  0xbc   :  { %113 = shalt.err (!%p110_p12)
}
  0xbd   :  { %s114_s1 = scalar_lea.hbm %s182_s2, 256 }
  0xbe   :  { %p115_p13 = scmp.ne.s32.totalorder %s182_s2, %s114_s1  ;;  %p118_p0 = scmp.lt.u32.totalorder %s114_s1, %s182_s2 }
  0xc0   :  { %p120_p1 = pnand %p118_p0, %p115_p13 }
  0xc2   :  { %123 = shalt.err (!%p120_p1)
}
  0xc3   :  { %65 = dma.vmem_to_hbm [thread:$0]  %s60_s25, 256, %s182_s2, [#allocation4], %s129_s19, %s129_s19, %s130_s20  }
  0xc4   :  { %126 = dma.done.wait [#allocation4], 256  }
  0xc5   :  { %127 = vsyncadd [#allocation4], 4294967040 }
  0xc6   :  { %69 = vsyncpa [#allocation3], 1 }
  0xc7   :  { %70 = vsyncpa [#allocation4], 1 }

</bundles_post_ra>
